<compile_context>
chip_gen: v6e
topology: v6e:2x2x1
jax: 0.10.0
libtpu: 0.0.40
codegen_flags: <defaults>
</compile_context>

<pallas_src>
import functools
import math

import jax
import jax.numpy as jnp
import numpy as np
from jax.experimental import pallas as pl
from jax.experimental.pallas import tpu as pltpu


# ----------------------------------------------------------------------------
# Pallas kernel: one grid step == bblk batch elements
# ----------------------------------------------------------------------------
def mpnn_kernel(edge_ref, adj_ref, x_ref, wm_ref, bmat_ref, wih_ref, whh_ref,
                bih_ref, bhh_ref, out_ref, *, compute_dtype):
    Bb, Np, NE = edge_ref.shape        # NE == Np * E (edge in native (i, j*E+e) order)
    F = x_ref.shape[-1]
    E = wm_ref.shape[0]
    cdt = compute_dtype

    x3 = x_ref[...]                                   # (Bb, Np, F)   f32
    x2 = x3.reshape(Bb * Np, F)                       # leading merge (free-ish)
    x2c = x2.astype(cdt)
    adj3 = adj_ref[...]                               # (Bb, Np, Np)  f32
    adj2c = adj3.reshape(Bb * Np, Np).astype(cdt)
    adj3c = adj3.astype(cdt)

    # --- adj_rep[b,i,j*E+e] = adj[b,i,j] via a tiny 0/1 selection matmul -----
    # (avoids any sublane->lane relayout / concatenate over edge-sized data)
    col = jax.lax.broadcasted_iota(jnp.int32, (Np, NE), 1)
    row = jax.lax.broadcasted_iota(jnp.int32, (Np, NE), 0)
    sel = ((col >= row * E) & (col < row * E + E)).astype(cdt)        # (Np, NE)
    adj_rep = jnp.dot(adj2c, sel, preferred_element_type=jnp.float32)  # (Bb*Np, NE)
    adj_rep = adj_rep.reshape(Bb, Np, NE).astype(cdt)

    # --- masked edge, straight from its native HBM layout --------------------
    aek = edge_ref[...].astype(cdt) * adj_rep                          # (Bb, Np, NE) bf16

    # --- y[b, j*E+e, f] = sum_d x[b,j,d] * wm[e,d,f]  (tiny, built per-channel)
    ys = []
    for e in range(E):
        ye = jnp.dot(x2c, wm_ref[e], preferred_element_type=jnp.float32)  # (Bb*Np, F)
        ys.append(ye.reshape(Bb, Np, 1, F))
    y = jnp.concatenate(ys, axis=2).reshape(Bb, Np * E, F).astype(cdt)    # (Bb, NE, F)

    # --- single big contraction over (j, e): message = aek @ y ---------------
    msg = jnp.einsum("bik,bkf->bif", aek, y,
                     preferred_element_type=jnp.float32)               # (Bb, Np, F) f32

    # --- Linear bias term of cal_message: adj @ (x @ b_msg_matrix) -----------
    xb = jnp.dot(x2c, bmat_ref[...], preferred_element_type=jnp.float32)
    xb3 = xb.reshape(Bb, Np, F).astype(cdt)
    msg = msg + jnp.einsum("bij,bjf->bif", adj3c, xb3,
                           preferred_element_type=jnp.float32)

    # --- GRUCell(input=msg, hidden=x): gates fused to 2 (M,F)x(F,3F) matmuls -
    agg = msg.reshape(Bb * Np, F)
    gi = jnp.dot(agg.astype(cdt), wih_ref[...],
                 preferred_element_type=jnp.float32) + bih_ref[...]
    gh = jnp.dot(x2c, whh_ref[...],
                 preferred_element_type=jnp.float32) + bhh_ref[...]

    r = jax.nn.sigmoid(gi[:, :F] + gh[:, :F])
    z = jax.nn.sigmoid(gi[:, F:2 * F] + gh[:, F:2 * F])
    n = jnp.tanh(gi[:, 2 * F:] + r * gh[:, 2 * F:])
    h = (1.0 - z) * n + z * x2

    out_ref[...] = (h + x2).astype(out_ref.dtype)      # residual: retval + x


# ----------------------------------------------------------------------------
# VMEM sizing helpers (lane/sublane padding + temporaries, generation-aware)
# ----------------------------------------------------------------------------
def _vmem_bytes(shape, dtype):
    itemsize = jnp.dtype(dtype).itemsize
    shape = tuple(shape)
    if len(shape) < 2:
        shape = (1,) + shape
    lead = math.prod(shape[:-2]) if len(shape) > 2 else 1
    sub_tile = 32 // itemsize                      # 8 for f32, 16 for bf16
    sub = -(-shape[-2] // sub_tile) * sub_tile
    lane = -(-shape[-1] // 128) * 128
    return lead * sub * lane * itemsize


def _estimate_vmem(bblk, Np, E, F):
    NE = Np * E
    f32, bf16 = jnp.float32, jnp.bfloat16
    io = 2 * (_vmem_bytes((bblk, Np, NE), f32)       # edge (double-buffered)
              + _vmem_bytes((bblk, Np, Np), f32)     # adj
              + _vmem_bytes((bblk, Np, F), f32)      # x
              + _vmem_bytes((bblk * Np, F), f32))    # out
    w = 2 * (_vmem_bytes((E, F, F), bf16) + _vmem_bytes((F, F), bf16)
             + 2 * _vmem_bytes((F, 3 * F), bf16) + 2 * _vmem_bytes((1, 3 * F), f32))
    tmp = (2 * _vmem_bytes((bblk, Np, NE), bf16)     # edge bf16 / aek
           + _vmem_bytes((bblk, Np, NE), f32)        # adj_rep (f32 accumulate)
           + _vmem_bytes((bblk, Np, NE), bf16)       # adj_rep (bf16)
           + 2 * _vmem_bytes((bblk, NE, F), f32)     # y staging
           + 2 * _vmem_bytes((bblk, Np, F), f32)     # msg
           + 4 * _vmem_bytes((bblk * Np, 3 * F), f32)
           + 6 * _vmem_bytes((bblk * Np, F), f32))
    return io + w + tmp + (1 << 20)                  # compiler-scratch headroom


def _vmem_budgets():
    kind = ""
    try:
        kind = jax.devices()[0].device_kind.lower()
    except Exception:
        pass
    if "v7" in kind:                                  # 64 MiB physical per TC
        return 16 << 20, 44 << 20
    return 40 << 20, 96 << 20                         # v5e / v6e: 128 MiB physical


def _pick_block_batch(B, Np, E, F, vmem_budget, *, max_rows=512):
    best = 1
    for bb in range(1, B + 1):
        if B % bb:
            continue
        if B >= 2 and B // bb < 2:      # keep >=2 grid steps (v7x has 2 TCs)
            continue
        if bb * Np > max_rows:
            continue
        if _estimate_vmem(bb, Np, E, F) > vmem_budget:
            continue
        best = bb
    return best


# ----------------------------------------------------------------------------
# Wrapper: parameter / layout plumbing + pallas_call
# ----------------------------------------------------------------------------
def mpnn_pallas(edge, adj, x, params, *, compute_dtype=jnp.bfloat16):
    B, N, _, E = edge.shape
    F_ = x.shape[-1]

    # Pad the node dim to a multiple of 8 only if necessary (no-op for the
    # example).  Padded adj rows/cols are zero, so padded outputs are inert
    # and sliced off below.
    Np = N + (-N) % 8
    if Np != N:
        pad_n = Np - N
        edge = jnp.pad(edge, ((0, 0), (0, pad_n), (0, pad_n), (0, 0)))
        adj = jnp.pad(adj, ((0, 0), (0, pad_n), (0, pad_n)))
        x = jnp.pad(x, ((0, 0), (0, pad_n), (0, 0)))

    NE = Np * E
    # Free trailing-dim merge; edge keeps its native dtype/order (one HBM read
    # in the kernel, no wrapper transpose/cast pass over the dominant tensor).
    edge_r = edge.reshape(B, Np, NE)
    adj = adj.astype(jnp.float32)
    x = x.astype(jnp.float32)

    # cal_message Linear(E -> F*F): wm[e,d,f] = w_msg[d*F+f, e]; bias matrix.
    wm = params["w_msg"].T.reshape(E, F_, F_).astype(compute_dtype)
    bmat = params["b_msg"].reshape(F_, F_).astype(compute_dtype)
    # GRUCell weights in fused-gate layout (F, 3F) = [r | z | n].
    wih = params["w_ih"].T.astype(compute_dtype)
    whh = params["w_hh"].T.astype(compute_dtype)
    bih = params["b_ih"].reshape(1, 3 * F_).astype(jnp.float32)
    bhh = params["b_hh"].reshape(1, 3 * F_).astype(jnp.float32)

    budget, limit_cap = _vmem_budgets()
    bblk = _pick_block_batch(B, Np, E, F_, budget)
    grid = (B // bblk,)

    vmem_need = _estimate_vmem(bblk, Np, E, F_)
    vmem_limit = int(min(limit_cap, max(4 * vmem_need, 32 << 20)))

    kernel = functools.partial(mpnn_kernel, compute_dtype=compute_dtype)

    flops = int(2 * B * Np * Np * NE            # adj_rep selection matmul
                + 2 * B * Np * NE * F_          # main aggregation matmul
                + 2 * B * Np * E * F_ * F_      # y construction
                + 2 * B * Np * F_ * F_          # bias channel (x @ b_msg)
                + 2 * B * Np * Np * F_          # bias channel (adj @ .)
                + 12 * B * Np * F_ * F_)        # fused GRU gates
    bytes_accessed = int(edge_r.size * 4 + adj.size * 4 + x.size * 4
                         + B * Np * F_ * 4
                         + (wm.size + bmat.size + wih.size + whh.size) * 2
                         + (bih.size + bhh.size) * 4)

    out = pl.pallas_call(
        kernel,
        out_shape=jax.ShapeDtypeStruct((B * Np, F_), x.dtype),
        grid_spec=pltpu.PrefetchScalarGridSpec(
            num_scalar_prefetch=0,
            grid=grid,
            in_specs=[
                pl.BlockSpec((bblk, Np, NE), lambda b: (b, 0, 0)),   # edge (native)
                pl.BlockSpec((bblk, Np, Np), lambda b: (b, 0, 0)),   # adj
                pl.BlockSpec((bblk, Np, F_), lambda b: (b, 0, 0)),   # x
                pl.BlockSpec((E, F_, F_), lambda b: (0, 0, 0)),      # wm
                pl.BlockSpec((F_, F_), lambda b: (0, 0)),            # b_msg matrix
                pl.BlockSpec((F_, 3 * F_), lambda b: (0, 0)),        # wih
                pl.BlockSpec((F_, 3 * F_), lambda b: (0, 0)),        # whh
                pl.BlockSpec((1, 3 * F_), lambda b: (0, 0)),         # bih
                pl.BlockSpec((1, 3 * F_), lambda b: (0, 0)),         # bhh
            ],
            out_specs=pl.BlockSpec((bblk * Np, F_), lambda b: (b, 0)),
        ),
        compiler_params=pltpu.CompilerParams(
            dimension_semantics=("parallel",),
            vmem_limit_bytes=vmem_limit),
        cost_estimate=pl.CostEstimate(flops=flops,
                                      transcendentals=int(3 * B * Np * F_),
                                      bytes_accessed=bytes_accessed),
    )(edge_r, adj, x, wm, bmat, wih, whh, bih, bhh)

    out = out.reshape(B, Np, F_)
    if Np != N:
        out = out[:, :N, :]
    return out


# ----------------------------------------------------------------------------
# Pure-JAX literal reference (mirrors the PyTorch forward op-by-op)
# ----------------------------------------------------------------------------
def mpnn_reference(edge, adj, x, params):
    B, N, _, E = edge.shape
    F_ = x.shape[-1]
    hi = jax.lax.Precision.HIGHEST

    mm = jnp.einsum("bijk,mk->bijm", edge, params["w_msg"], precision=hi) + params["b_msg"]
    mm = mm.reshape(B, N, N, F_, F_)
    x_rep = jnp.broadcast_to(x[:, None, :, :], (B, N, N, F_))[..., None, :]   # (B,N,N,1,F)
    message = jnp.einsum("abcde,abcef->abcdf", x_rep, mm, precision=hi)[..., 0, :]
    message = message * adj[..., None]
    message = message.sum(axis=2)                                             # (B, N, F)

    rm = message.reshape(-1, F_)
    rx = x.reshape(-1, F_)
    gi = jnp.dot(rm, params["w_ih"].T, precision=hi) + params["b_ih"]
    gh = jnp.dot(rx, params["w_hh"].T, precision=hi) + params["b_hh"]
    r = jax.nn.sigmoid(gi[:, :F_] + gh[:, :F_])
    z = jax.nn.sigmoid(gi[:, F_:2 * F_] + gh[:, F_:2 * F_])
    n = jnp.tanh(gi[:, 2 * F_:] + r * gh[:, 2 * F_:])
    h = (1.0 - z) * n + z * rx
    return h.reshape(B, N, F_) + x


# ----------------------------------------------------------------------------
if __name__ == "__main__":
    B, N = 2, 8                 # batch, number of atoms
    E, F_ = 4, 8                # n_edge_feature, n_atom_feature

    key = jax.random.PRNGKey(0)
    k_edge, k_adj, k_x, k1, k2, k3, k4, k5, k6 = jax.random.split(key, 9)

    edge = jax.random.normal(k_edge, (B, N, N, E), dtype=jnp.float32)
    adj = jax.random.bernoulli(k_adj, 0.5, (B, N, N)).astype(jnp.float32)
    x = jax.random.normal(k_x, (B, N, F_), dtype=jnp.float32)

    # Deterministic synthetic parameters (PyTorch param shapes).
    params = {
        "w_msg": 0.1 * jax.random.normal(k1, (F_ * F_, E), dtype=jnp.float32),   # Linear.weight
        "b_msg": 0.1 * jax.random.normal(k2, (F_ * F_,), dtype=jnp.float32),     # Linear.bias
        "w_ih": 0.1 * jax.random.normal(k3, (3 * F_, F_), dtype=jnp.float32),    # GRUCell.weight_ih
        "w_hh": 0.1 * jax.random.normal(k4, (3 * F_, F_), dtype=jnp.float32),    # GRUCell.weight_hh
        "b_ih": 0.1 * jax.random.normal(k5, (3 * F_,), dtype=jnp.float32),
        "b_hh": 0.1 * jax.random.normal(k6, (3 * F_,), dtype=jnp.float32),
    }
    # TODO(synk): module's self.W MLP is defined but never used in forward(); omitted.

    out = mpnn_pallas(edge, adj, x, params)
    out = jax.block_until_ready(out)

    ref = jax.block_until_ready(mpnn_reference(edge, adj, x, params))
    np.testing.assert_allclose(np.asarray(out), np.asarray(ref), rtol=5e-2, atol=5e-2)

    print("KERNEL_OK")
</pallas_src>

<mosaic_0001>
module attributes {stable_mosaic.version = 11 : i64} {
  func.func @mpnn_kernel(%arg0: i32, %arg1: memref<1x8x32xf32, #tpu.memory_space<vmem>>, %arg2: memref<1x8x8xf32, #tpu.memory_space<vmem>>, %arg3: memref<1x8x8xf32, #tpu.memory_space<vmem>>, %arg4: memref<4x8x8xbf16, #tpu.memory_space<vmem>>, %arg5: memref<8x8xbf16, #tpu.memory_space<vmem>>, %arg6: memref<8x24xbf16, #tpu.memory_space<vmem>>, %arg7: memref<8x24xbf16, #tpu.memory_space<vmem>>, %arg8: memref<1x24xf32, #tpu.memory_space<vmem>>, %arg9: memref<1x24xf32, #tpu.memory_space<vmem>>, %arg10: memref<8x8xf32, #tpu.memory_space<vmem>>) attributes {dimension_semantics = [#tpu.dimension_semantics<parallel>], iteration_bounds = array<i64: 2>, scalar_prefetch = 0 : i64, scratch_operands = 0 : i64, tpu.core_type = #tpu.core_type<tc>, window_params = [{transform_indices = @transform_0, window_bounds = array<i64: 1, 8, 32>}, {transform_indices = @transform_1, window_bounds = array<i64: 1, 8, 8>}, {transform_indices = @transform_2, window_bounds = array<i64: 1, 8, 8>}, {pipeline_mode = #tpu.pipeline_mode<synchronous>, transform_indices = @transform_3, window_bounds = array<i64: 4, 8, 8>}, {pipeline_mode = #tpu.pipeline_mode<synchronous>, transform_indices = @transform_4, window_bounds = array<i64: 8, 8>}, {pipeline_mode = #tpu.pipeline_mode<synchronous>, transform_indices = @transform_5, window_bounds = array<i64: 8, 24>}, {pipeline_mode = #tpu.pipeline_mode<synchronous>, transform_indices = @transform_6, window_bounds = array<i64: 8, 24>}, {pipeline_mode = #tpu.pipeline_mode<synchronous>, transform_indices = @transform_7, window_bounds = array<i64: 1, 24>}, {pipeline_mode = #tpu.pipeline_mode<synchronous>, transform_indices = @transform_8, window_bounds = array<i64: 1, 24>}, {transform_indices = @transform_9, window_bounds = array<i64: 8, 8>}]} {
    %c0 = arith.constant 0 : index
    %c0_0 = arith.constant 0 : index
    %c0_1 = arith.constant 0 : index
    %0 = vector.load %arg3[%c0, %c0_0, %c0_1] : memref<1x8x8xf32, #tpu.memory_space<vmem>>, vector<1x8x8xf32>
    %1 = vector.shape_cast %0 : vector<1x8x8xf32> to vector<8x8xf32>
    %2 = arith.truncf %1 : vector<8x8xf32> to vector<8x8xbf16>
    %c0_2 = arith.constant 0 : index
    %c0_3 = arith.constant 0 : index
    %c0_4 = arith.constant 0 : index
    %3 = vector.load %arg2[%c0_2, %c0_3, %c0_4] : memref<1x8x8xf32, #tpu.memory_space<vmem>>, vector<1x8x8xf32>
    %4 = vector.shape_cast %3 : vector<1x8x8xf32> to vector<8x8xf32>
    %5 = arith.truncf %4 : vector<8x8xf32> to vector<8x8xbf16>
    %6 = arith.truncf %3 : vector<1x8x8xf32> to vector<1x8x8xbf16>
    %7 = tpu.iota {dimensions = array<i32: 1>} : vector<8x32xi32>
    %8 = tpu.iota {dimensions = array<i32: 0>} : vector<8x32xi32>
    %c4_i32 = arith.constant 4 : i32
    %9 = vector.broadcast %c4_i32 : i32 to vector<8x32xi32>
    %10 = arith.muli %8, %9 : vector<8x32xi32>
    %11 = arith.cmpi sge, %7, %10 : vector<8x32xi32>
    %c4_i32_5 = arith.constant 4 : i32
    %12 = vector.broadcast %c4_i32_5 : i32 to vector<8x32xi32>
    %13 = arith.muli %8, %12 : vector<8x32xi32>
    %c4_i32_6 = arith.constant 4 : i32
    %14 = vector.broadcast %c4_i32_6 : i32 to vector<8x32xi32>
    %15 = arith.addi %13, %14 : vector<8x32xi32>
    %16 = arith.cmpi slt, %7, %15 : vector<8x32xi32>
    %17 = arith.andi %11, %16 : vector<8x32xi1>
    %18 = arith.extui %17 : vector<8x32xi1> to vector<8x32xi32>
    %19 = arith.sitofp %18 : vector<8x32xi32> to vector<8x32xf32>
    %20 = arith.truncf %19 : vector<8x32xf32> to vector<8x32xbf16>
    %cst = arith.constant dense<0.000000e+00> : vector<8x32xf32>
    %21 = tpu.matmul %5, %20, %cst {dimension_numbers = #tpu.dot_dimension_numbers<[1], [0], [0], [1], [0, 0, 1, 1], [], []>} : vector<8x8xbf16>, vector<8x32xbf16>, vector<8x32xf32> -> vector<8x32xf32>
    %22 = vector.shape_cast %21 : vector<8x32xf32> to vector<1x8x32xf32>
    %23 = arith.truncf %22 : vector<1x8x32xf32> to vector<1x8x32xbf16>
    %c0_7 = arith.constant 0 : index
    %c0_8 = arith.constant 0 : index
    %c0_9 = arith.constant 0 : index
    %24 = vector.load %arg1[%c0_7, %c0_8, %c0_9] : memref<1x8x32xf32, #tpu.memory_space<vmem>>, vector<1x8x32xf32>
    %25 = arith.truncf %24 : vector<1x8x32xf32> to vector<1x8x32xbf16>
    %26 = arith.mulf %25, %23 : vector<1x8x32xbf16>
    %c0_10 = arith.constant 0 : index
    %c0_11 = arith.constant 0 : index
    %c0_12 = arith.constant 0 : index
    %27 = vector.load %arg4[%c0_10, %c0_11, %c0_12] : memref<4x8x8xbf16, #tpu.memory_space<vmem>>, vector<1x8x8xbf16>
    %28 = vector.shape_cast %27 : vector<1x8x8xbf16> to vector<8x8xbf16>
    %cst_13 = arith.constant dense<0.000000e+00> : vector<8x8xf32>
    %29 = tpu.matmul %2, %28, %cst_13 {dimension_numbers = #tpu.dot_dimension_numbers<[1], [0], [0], [1], [0, 0, 1, 1], [], []>} : vector<8x8xbf16>, vector<8x8xbf16>, vector<8x8xf32> -> vector<8x8xf32>
    %30 = vector.shape_cast %29 : vector<8x8xf32> to vector<1x8x1x8xf32>
    %c1 = arith.constant 1 : index
    %c0_14 = arith.constant 0 : index
    %c0_15 = arith.constant 0 : index
    %31 = vector.load %arg4[%c1, %c0_14, %c0_15] : memref<4x8x8xbf16, #tpu.memory_space<vmem>>, vector<1x8x8xbf16>
    %32 = vector.shape_cast %31 : vector<1x8x8xbf16> to vector<8x8xbf16>
    %cst_16 = arith.constant dense<0.000000e+00> : vector<8x8xf32>
    %33 = tpu.matmul %2, %32, %cst_16 {dimension_numbers = #tpu.dot_dimension_numbers<[1], [0], [0], [1], [0, 0, 1, 1], [], []>} : vector<8x8xbf16>, vector<8x8xbf16>, vector<8x8xf32> -> vector<8x8xf32>
    %34 = vector.shape_cast %33 : vector<8x8xf32> to vector<1x8x1x8xf32>
    %c2 = arith.constant 2 : index
    %c0_17 = arith.constant 0 : index
    %c0_18 = arith.constant 0 : index
    %35 = vector.load %arg4[%c2, %c0_17, %c0_18] : memref<4x8x8xbf16, #tpu.memory_space<vmem>>, vector<1x8x8xbf16>
    %36 = vector.shape_cast %35 : vector<1x8x8xbf16> to vector<8x8xbf16>
    %cst_19 = arith.constant dense<0.000000e+00> : vector<8x8xf32>
    %37 = tpu.matmul %2, %36, %cst_19 {dimension_numbers = #tpu.dot_dimension_numbers<[1], [0], [0], [1], [0, 0, 1, 1], [], []>} : vector<8x8xbf16>, vector<8x8xbf16>, vector<8x8xf32> -> vector<8x8xf32>
    %38 = vector.shape_cast %37 : vector<8x8xf32> to vector<1x8x1x8xf32>
    %c3 = arith.constant 3 : index
    %c0_20 = arith.constant 0 : index
    %c0_21 = arith.constant 0 : index
    %39 = vector.load %arg4[%c3, %c0_20, %c0_21] : memref<4x8x8xbf16, #tpu.memory_space<vmem>>, vector<1x8x8xbf16>
    %40 = vector.shape_cast %39 : vector<1x8x8xbf16> to vector<8x8xbf16>
    %cst_22 = arith.constant dense<0.000000e+00> : vector<8x8xf32>
    %41 = tpu.matmul %2, %40, %cst_22 {dimension_numbers = #tpu.dot_dimension_numbers<[1], [0], [0], [1], [0, 0, 1, 1], [], []>} : vector<8x8xbf16>, vector<8x8xbf16>, vector<8x8xf32> -> vector<8x8xf32>
    %42 = vector.shape_cast %41 : vector<8x8xf32> to vector<1x8x1x8xf32>
    %43 = tpu.concatenate %30, %34, %38, %42 in 2 : vector<1x8x1x8xf32>, vector<1x8x1x8xf32>, vector<1x8x1x8xf32>, vector<1x8x1x8xf32> -> vector<1x8x4x8xf32>
    %44 = vector.shape_cast %43 : vector<1x8x4x8xf32> to vector<1x32x8xf32>
    %45 = arith.truncf %44 : vector<1x32x8xf32> to vector<1x32x8xbf16>
    "tpu.trace_start"() <{level = 10 : i32, message = "bik,bkf->bif"}> : () -> ()
    %cst_23 = arith.constant dense<0.000000e+00> : vector<1x8x8xf32>
    %46 = tpu.matmul %26, %45, %cst_23 {dimension_numbers = #tpu.dot_dimension_numbers<[2], [1], [1], [2], [0, 0, 0, 1, 1, 2], [0], [0]>} : vector<1x8x32xbf16>, vector<1x32x8xbf16>, vector<1x8x8xf32> -> vector<1x8x8xf32>
    "tpu.trace_stop"() : () -> ()
    %c0_24 = arith.constant 0 : index
    %c0_25 = arith.constant 0 : index
    %47 = vector.load %arg5[%c0_24, %c0_25] : memref<8x8xbf16, #tpu.memory_space<vmem>>, vector<8x8xbf16>
    %cst_26 = arith.constant dense<0.000000e+00> : vector<8x8xf32>
    %48 = tpu.matmul %2, %47, %cst_26 {dimension_numbers = #tpu.dot_dimension_numbers<[1], [0], [0], [1], [0, 0, 1, 1], [], []>} : vector<8x8xbf16>, vector<8x8xbf16>, vector<8x8xf32> -> vector<8x8xf32>
    %49 = vector.shape_cast %48 : vector<8x8xf32> to vector<1x8x8xf32>
    %50 = arith.truncf %49 : vector<1x8x8xf32> to vector<1x8x8xbf16>
    "tpu.trace_start"() <{level = 10 : i32, message = "bij,bjf->bif"}> : () -> ()
    %cst_27 = arith.constant dense<0.000000e+00> : vector<1x8x8xf32>
    %51 = tpu.matmul %6, %50, %cst_27 {dimension_numbers = #tpu.dot_dimension_numbers<[2], [1], [1], [2], [0, 0, 0, 1, 1, 2], [0], [0]>} : vector<1x8x8xbf16>, vector<1x8x8xbf16>, vector<1x8x8xf32> -> vector<1x8x8xf32>
    "tpu.trace_stop"() : () -> ()
    %52 = arith.addf %46, %51 : vector<1x8x8xf32>
    %53 = vector.shape_cast %52 : vector<1x8x8xf32> to vector<8x8xf32>
    %54 = arith.truncf %53 : vector<8x8xf32> to vector<8x8xbf16>
    %c0_28 = arith.constant 0 : index
    %c0_29 = arith.constant 0 : index
    %55 = vector.load %arg6[%c0_28, %c0_29] : memref<8x24xbf16, #tpu.memory_space<vmem>>, vector<8x24xbf16>
    %cst_30 = arith.constant dense<0.000000e+00> : vector<8x24xf32>
    %56 = tpu.matmul %54, %55, %cst_30 {dimension_numbers = #tpu.dot_dimension_numbers<[1], [0], [0], [1], [0, 0, 1, 1], [], []>} : vector<8x8xbf16>, vector<8x24xbf16>, vector<8x24xf32> -> vector<8x24xf32>
    %c0_31 = arith.constant 0 : index
    %c0_32 = arith.constant 0 : index
    %57 = vector.load %arg8[%c0_31, %c0_32] : memref<1x24xf32, #tpu.memory_space<vmem>>, vector<1x24xf32>
    %58 = vector.broadcast %57 : vector<1x24xf32> to vector<8x24xf32>
    %59 = arith.addf %56, %58 : vector<8x24xf32>
    %c0_33 = arith.constant 0 : index
    %c0_34 = arith.constant 0 : index
    %60 = vector.load %arg7[%c0_33, %c0_34] : memref<8x24xbf16, #tpu.memory_space<vmem>>, vector<8x24xbf16>
    %cst_35 = arith.constant dense<0.000000e+00> : vector<8x24xf32>
    %61 = tpu.matmul %2, %60, %cst_35 {dimension_numbers = #tpu.dot_dimension_numbers<[1], [0], [0], [1], [0, 0, 1, 1], [], []>} : vector<8x8xbf16>, vector<8x24xbf16>, vector<8x24xf32> -> vector<8x24xf32>
    %c0_36 = arith.constant 0 : index
    %c0_37 = arith.constant 0 : index
    %62 = vector.load %arg9[%c0_36, %c0_37] : memref<1x24xf32, #tpu.memory_space<vmem>>, vector<1x24xf32>
    %63 = vector.broadcast %62 : vector<1x24xf32> to vector<8x24xf32>
    %64 = arith.addf %61, %63 : vector<8x24xf32>
    %65 = vector.extract_strided_slice %59 {offsets = [0, 0], sizes = [8, 8], strides = [1, 1]} : vector<8x24xf32> to vector<8x8xf32>
    %66 = vector.extract_strided_slice %64 {offsets = [0, 0], sizes = [8, 8], strides = [1, 1]} : vector<8x24xf32> to vector<8x8xf32>
    %67 = arith.addf %65, %66 : vector<8x8xf32>
    %68 = arith.negf %67 : vector<8x8xf32>
    %69 = math.exp %68 : vector<8x8xf32>
    %cst_38 = arith.constant 1.000000e+00 : f32
    %70 = vector.broadcast %cst_38 : f32 to vector<8x8xf32>
    %71 = arith.addf %70, %69 : vector<8x8xf32>
    %72 = arith.divf %70, %71 : vector<8x8xf32>
    %73 = vector.extract_strided_slice %59 {offsets = [0, 8], sizes = [8, 8], strides = [1, 1]} : vector<8x24xf32> to vector<8x8xf32>
    %74 = vector.extract_strided_slice %64 {offsets = [0, 8], sizes = [8, 8], strides = [1, 1]} : vector<8x24xf32> to vector<8x8xf32>
    %75 = arith.addf %73, %74 : vector<8x8xf32>
    %76 = arith.negf %75 : vector<8x8xf32>
    %77 = math.exp %76 : vector<8x8xf32>
    %cst_39 = arith.constant 1.000000e+00 : f32
    %78 = vector.broadcast %cst_39 : f32 to vector<8x8xf32>
    %79 = arith.addf %78, %77 : vector<8x8xf32>
    %80 = arith.divf %78, %79 : vector<8x8xf32>
    %81 = vector.extract_strided_slice %59 {offsets = [0, 16], sizes = [8, 8], strides = [1, 1]} : vector<8x24xf32> to vector<8x8xf32>
    %82 = vector.extract_strided_slice %64 {offsets = [0, 16], sizes = [8, 8], strides = [1, 1]} : vector<8x24xf32> to vector<8x8xf32>
    %83 = arith.mulf %72, %82 : vector<8x8xf32>
    %84 = arith.addf %81, %83 : vector<8x8xf32>
    %85 = math.tanh %84 : vector<8x8xf32>
    %cst_40 = arith.constant 1.000000e+00 : f32
    %86 = vector.broadcast %cst_40 : f32 to vector<8x8xf32>
    %87 = arith.subf %86, %80 : vector<8x8xf32>
    %88 = arith.mulf %87, %85 : vector<8x8xf32>
    %89 = arith.mulf %80, %1 : vector<8x8xf32>
    %90 = arith.addf %88, %89 : vector<8x8xf32>
    %91 = arith.addf %90, %1 : vector<8x8xf32>
    %c0_41 = arith.constant 0 : index
    %c0_42 = arith.constant 0 : index
    %92 = vector.load %arg10[%c0_41, %c0_42] : memref<8x8xf32, #tpu.memory_space<vmem>>, vector<8x8xf32>
    tpu.vector_store %arg10[%c0_41, %c0_42], %91 {strides = array<i32>} : memref<8x8xf32, #tpu.memory_space<vmem>>, vector<8x8xf32>,
    return
  }
  func.func @transform_0(%arg0: i32) -> (i32, i32, i32) {
    %c0_i32 = arith.constant 0 : i32
    %c0_i32_0 = arith.constant 0 : i32
    %c0_i32_1 = arith.constant 0 : i32
    return %arg0, %c0_i32, %c0_i32_0 : i32, i32, i32
  }
  func.func @transform_1(%arg0: i32) -> (i32, i32, i32) {
    %c0_i32 = arith.constant 0 : i32
    %c0_i32_0 = arith.constant 0 : i32
    %c0_i32_1 = arith.constant 0 : i32
    return %arg0, %c0_i32, %c0_i32_0 : i32, i32, i32
  }
  func.func @transform_2(%arg0: i32) -> (i32, i32, i32) {
    %c0_i32 = arith.constant 0 : i32
    %c0_i32_0 = arith.constant 0 : i32
    %c0_i32_1 = arith.constant 0 : i32
    return %arg0, %c0_i32, %c0_i32_0 : i32, i32, i32
  }
  func.func @transform_3(%arg0: i32) -> (i32, i32, i32) {
    %c0_i32 = arith.constant 0 : i32
    %c0_i32_0 = arith.constant 0 : i32
    %c0_i32_1 = arith.constant 0 : i32
    %c0_i32_2 = arith.constant 0 : i32
    return %c0_i32, %c0_i32_0, %c0_i32_1 : i32, i32, i32
  }
  func.func @transform_4(%arg0: i32) -> (i32, i32) {
    %c0_i32 = arith.constant 0 : i32
    %c0_i32_0 = arith.constant 0 : i32
    %c0_i32_1 = arith.constant 0 : i32
    return %c0_i32, %c0_i32_0 : i32, i32
  }
  func.func @transform_5(%arg0: i32) -> (i32, i32) {
    %c0_i32 = arith.constant 0 : i32
    %c0_i32_0 = arith.constant 0 : i32
    %c0_i32_1 = arith.constant 0 : i32
    return %c0_i32, %c0_i32_0 : i32, i32
  }
  func.func @transform_6(%arg0: i32) -> (i32, i32) {
    %c0_i32 = arith.constant 0 : i32
    %c0_i32_0 = arith.constant 0 : i32
    %c0_i32_1 = arith.constant 0 : i32
    return %c0_i32, %c0_i32_0 : i32, i32
  }
  func.func @transform_7(%arg0: i32) -> (i32, i32) {
    %c0_i32 = arith.constant 0 : i32
    %c0_i32_0 = arith.constant 0 : i32
    %c0_i32_1 = arith.constant 0 : i32
    return %c0_i32, %c0_i32_0 : i32, i32
  }
  func.func @transform_8(%arg0: i32) -> (i32, i32) {
    %c0_i32 = arith.constant 0 : i32
    %c0_i32_0 = arith.constant 0 : i32
    %c0_i32_1 = arith.constant 0 : i32
    return %c0_i32, %c0_i32_0 : i32, i32
  }
  func.func @transform_9(%arg0: i32) -> (i32, i32) {
    %c0_i32 = arith.constant 0 : i32
    %c0_i32_0 = arith.constant 0 : i32
    return %arg0, %c0_i32 : i32, i32
  }
}

</mosaic_0001>

<bundles_post_ra>
// kernel: tpu_custom_call.1
= control target key start
LH: loop header
LB: loop body
LE: loop exit
PB: predicated region body
PF: predicated region fallthrough
CT: control target
= control target key end

     0   :  { %s2349_s0 = inlined_call_operand.hbm [shape: f32[2,8,32], index: 0, kind: input, shape index: {}]   ;;  %s2350_s1 = inlined_call_operand.hbm [shape: f32[2,8,8], index: 1, kind: input, shape index: {}]   ;;  %s2351_s2 = inlined_call_operand.hbm [shape: f32[2,8,8], index: 2, kind: input, shape index: {}]   ;;  %s2352_s3 = inlined_call_operand.hbm [shape: bf16[4,8,8], index: 3, kind: input, shape index: {}]   ;;  %s2353_s4 = inlined_call_operand.vmem [shape: bf16[8,8], index: 4, kind: input, shape index: {}]   ;;  %s2354_s5 = inlined_call_operand.vmem [shape: bf16[8,24], index: 5, kind: input, shape index: {}]   ;;  %s2355_s6 = inlined_call_operand.hbm [shape: bf16[8,24], index: 6, kind: input, shape index: {}]   ;;  %s2356_s7 = inlined_call_operand.vmem [shape: f32[1,24], index: 7, kind: input, shape index: {}]   ;;  %s2357_s8 = inlined_call_operand.vmem [shape: f32[1,24], index: 8, kind: input, shape index: {}]   ;;  %s2358_s9 = inlined_call_operand.vmem [shape: f32[16,8], index: 9, kind: output, shape index: {}]  }
   0x1   :  { %2370 = sst [smem:[#allocation15_spill]] %s2350_s1 }
   0x2   :  { %2371 = sst [smem:[#allocation16_spill]] %s2352_s3 }
   0x3   :  { %2372 = sst [smem:[#allocation17_spill]] %s2355_s6 }
   0x4   :  { %14 = vsyncpa [#allocation3], 0 }
   0x5   :  { %16 = vsyncpa [#allocation3 + $0x1], 0 }
   0x6   :  { %17 = vsyncpa [#allocation5], 0 }
   0x7   :  { %19 = vsyncpa [#allocation5 + $0x1], 0 }
   0x8   :  { %20 = vsyncpa [#allocation8], 0  ;;  %s1917_s30 = smov 0   ;;  %s1919_s10 = smov 0  }
   0x9   :  { %s1921_s11 = smov 0   ;;  %s1923_s12 = smov 0  }
   0xa LB: > { %s1936_s13 = sadd.s32 4294967295, %s1851_s12   ;;  %p46_p0 = scmp.ne.s32.totalorder %s1843_s10, %s1839_s30  ;;  %s1851_s12 = sphi %s1923_s12, %s2391_s12   ;;  %s1847_s11 = sphi %s1921_s11, %s2395_s11   ;;  %s1843_s10 = sphi %s1919_s10, %s2394_s10   ;;  %s1839_s30 = sphi %s1917_s30, %s2393_s30  }
   0xb   : > { %p2362_p1 = scmp.eq.s32.totalorder %s1936_s13, 0  ;;  %p1472_p2 = scmp.ge.s32.totalorder %s1851_s12, 1 }
   0xc   : > { %p261_p3 = scmp.lt.s32.totalorder %s1851_s12, 3  ;;  %s1853_s16 = smov [#allocation7]  }
   0xd   : > { %p1944_p4 = por %p2362_p1, %p46_p0  ;;  %s273_s17 = sshll.u32 %s1853_s16, 4  ;;  %s274_s17 = int_to_ptr.vmem [resolvable:$true] %s273_s17 }
   0xe   : > { %p1948_p5 = pnand %p1472_p2, %p261_p3  ;;  %s1961_s19 = sadd.s32 1, %s1851_s12  }
   0xf   : > { %s2373_s14 = scalar_select %p1944_p4, 1, 0 }
  0x10   : > { %s2374_s15 = scalar_select %p1948_p5, 1, 0 }
  0x11   : > { %p1602_p6 = pneg %p1948_p5  ;;  %2376 = sst [smem:[#allocation13_spill]] %s1961_s19 }
  0x12   : > { %s33_s20 = sadd.s32 1, %s1847_s11  ;;  %s30_s21 = ssub.s32 %s1851_s12, %s1961_s19 }
  0x13   : > { %p1956_p7 = pnand %p1602_p6, %p2362_p1  ;;  %s1684_s22 = scalar_lea.vmem %s274_s17, 256 }
  0x14   : > { %p1685_p9 = scmp.ne.s32.totalorder %s274_s17, %s1684_s22  ;;  %p1692_p12 = scmp.lt.s32.totalorder %s274_s17, %s274_s17 }
  0x15   : > { %s2375_s18 = scalar_select %p1956_p7, 1, 0 }
  0x16   : > { %p2363_p8 = pneg %p1956_p7  ;;  %p1693_p13 = scmp.lt.s32.totalorder %s1684_s22, %s1684_s22 }
  0x18   : > { %p1687_p10 = pnand %p1685_p9, %p2363_p8  ;;  %p1694_p0 = por %p1693_p13, %p1692_p12 }
  0x1a   : > { %p1688_p11 = pneg %p1687_p10 }
  0x1c   : > { %p1695_p2 = pnand %p1694_p0, %p1688_p11 }
  0x1e   : > { %1698 = shalt.err (!%p1695_p2)
}
  0x1f   : > { %s1854_s23 = smov 64   ;;  %s1855_s24 = smov 4  }
  0x20   : > { %s2377_s3 = sld [smem:[#allocation16_spill]]  ;;  %p31_p3 = scmp.eq.s32.totalorder %s30_s21, 0 }
  0x21   : > { %p40_p6 = scmp.ne.s32.totalorder %s1847_s11, %s1843_s10  ;;  %p41_p9 = scmp.eq.s32.totalorder %s1851_s12, 0 }
  0x22   : > { %p1621_p10 = scmp.lt.s32.totalorder %s1851_s12, 2  ;;  %s2359_s28 = sand.u32 1, %s1847_s11  }
  0x23   : > { %s1981_s27 = scalar_select %p31_p3, %s1847_s11, %s33_s20  }
  0x24   : > { %p42_p11 = por %p41_p9, %p40_p6  ;;  %s1986_s29 = sshll.u32 %s2359_s28, 3 }
  0x25   : > { %2378 = sst [smem:[#allocation14_spill]] %s1981_s27  ;;  %s1989_s30 = sshll.u32 %s1851_s12, 7 }
  0x26   : > { %1605 = dma.hbm_to_vmem [thread:$0]  (!%p1956_p7), %s2377_s3, 256, %s274_s17, [#allocation8], %s1854_s23, %s1854_s23, %s1855_s24  }
  0x27   : > { %p1991_p12 = pnand %p1621_p10, %p42_p11  ;;  %s328_s17 = sand.u32 1, %s1851_s12  }
  0x28   : > { %s2380_s1 = sld [smem:[#allocation15_spill]]  ;;  %s332_s23 = scalar_lea.vmem [#allocation4], %s1986_s29 }
  0x29   : > { %s339_s24 = sshll.u32 %s332_s23, 4  ;;  %s1856_s25 = smov [#allocation9]   ;;  %s2003_s24 = int_to_ptr.vmem [resolvable:$true] %s339_s24 }
  0x2a   : > { %s293_s26 = sshll.u32 %s1856_s25, 4  ;;  %s2005_s28 = scalar_lea.sflag [#allocation5], %s328_s17  ;;  %s294_s26 = int_to_ptr.vmem [resolvable:$true] %s293_s26 }
  0x2b   : > { %p2011_p0 = pneg %p1991_p12 }
  0x2d   : > { %s2381_s12 = scalar_select %p2011_p0, 1, 0 }
  0x2e   : > { %s2000_s20 = scalar_lea.hbm %s2380_s1, %s1989_s30  ;;  %s1704_s23 = scalar_lea.hbm %s2380_s1, 256 }
  0x2f   : > { %s1699_s3 = scalar_lea.hbm %s2000_s20, 128  ;;  %p1705_p6 = scmp.lt.s32.totalorder %s2000_s20, %s2380_s1 }
  0x30   : > { %p1700_p13 = scmp.ne.s32.totalorder %s2000_s20, %s1699_s3  ;;  %p1706_p9 = scmp.lt.s32.totalorder %s1704_s23, %s1699_s3 }
  0x32   : > { %p1702_p2 = pnand %p2011_p0, %p1700_p13  ;;  %p1707_p10 = por %p1706_p9, %p1705_p6 }
  0x34   : > { %p1703_p3 = pneg %p1702_p2 }
  0x36   : > { %p1708_p11 = pnand %p1707_p10, %p1703_p3 }
  0x38   : > { %1711 = shalt.err (!%p1708_p11)
}
  0x39   : > { %s1712_s17 = scalar_lea.vmem %s2003_s24, 128  ;;  %s1857_s25 = smov [#allocation4]  }
  0x3a   : > { %p1713_p1 = scmp.ne.s32.totalorder %s2003_s24, %s1712_s17  ;;  %s1717_s21 = sshll.u32 %s1857_s25, 4  ;;  %s1718_s21 = int_to_ptr.vmem [resolvable:$false] %s1717_s21 }
  0x3b   : > { %s1719_s22 = scalar_lea.vmem %s1718_s21, 256  ;;  %p1720_p8 = scmp.lt.s32.totalorder %s2003_s24, %s1718_s21 }
  0x3c   : > { %p1715_p13 = pnand %p1713_p1, %p2011_p0  ;;  %p1721_p4 = scmp.lt.s32.totalorder %s1719_s22, %s1712_s17 }
  0x3e   : > { %p1716_p2 = pneg %p1715_p13  ;;  %p1722_p5 = por %p1721_p4, %p1720_p8 }
  0x40   : > { %p1723_p7 = pnand %p1722_p5, %p1716_p2 }
  0x42   : > { %1726 = shalt.err (!%p1723_p7)
}
  0x43   : > { %1615 = dma.hbm_to_vmem [thread:$0]  (!%p1991_p12), %s2000_s20, 128, %s2003_s24, %s2005_s28  }
  0x44   : > { %s1738_s3 = scalar_lea.vmem %s294_s26, 64  ;;  %p2382_p3 = scmp.ne.s32.totalorder %s2375_s18, 0 }
  0x45   : > { %p1739_p1 = scmp.ne.s32.totalorder %s294_s26, %s1738_s3  ;;  %p1746_p11 = scmp.lt.s32.totalorder %s294_s26, %s294_s26 }
  0x46   : > { %p2383_p6 = pneg %p2382_p3  ;;  %p1747_p13 = scmp.lt.s32.totalorder %s1738_s3, %s1738_s3 }
  0x48   : > { %p1741_p9 = pnand %p1739_p1, %p2383_p6  ;;  %p1748_p0 = por %p1747_p13, %p1746_p11 }
  0x4a   : > { %p1742_p10 = pneg %p1741_p9 }
  0x4c   : > { %p1749_p4 = pnand %p1748_p0, %p1742_p10 }
  0x4e   : > { %1752 = shalt.err (!%p1749_p4)
}
  0x4f   : > { %s2384_s6 = sld [smem:[#allocation17_spill]]  ;;  %s2046_s23 = scalar_lea.hbm %s2349_s0, %s1989_s30 }
  0x50   : > { %s314_s17 = scalar_lea.vmem [#allocation2], %s1986_s29  ;;  %s2053_s22 = scalar_lea.hbm %s2351_s2, %s1989_s30 }
  0x51   : > { %s321_s25 = sshll.u32 %s314_s17, 4  ;;  %s2385_s3 = sand.u32 1, %s1847_s11   ;;  %s322_s25 = int_to_ptr.vmem [resolvable:$true] %s321_s25 }
  0x52   : > { %s311_s19 = scalar_lea.sflag [#allocation3], %s2385_s3  ;;  %s1753_s27 = scalar_lea.hbm %s2046_s23, 128 }
  0x53   : > { %p1754_p5 = scmp.ne.s32.totalorder %s2046_s23, %s1753_s27  ;;  %p2386_p7 = scmp.ne.s32.totalorder %s2381_s12, 0 }
  0x54   : > { %s1758_s24 = scalar_lea.hbm %s2349_s0, 256  ;;  %p1759_p2 = scmp.lt.s32.totalorder %s2046_s23, %s2349_s0 }
  0x55   : > { %1608 = dma.hbm_to_vmem [thread:$0]  (!%p2382_p3), %s2384_s6, 64, %s294_s26, [#allocation8]  }
  0x56   : > { %p1756_p8 = pnand %p1754_p5, %p2386_p7  ;;  %p1760_p1 = scmp.lt.s32.totalorder %s1758_s24, %s1753_s27 }
  0x58   : > { %p1757_p0 = pneg %p1756_p8  ;;  %p1761_p3 = por %p1760_p1, %p1759_p2 }
  0x5a   : > { %p1762_p6 = pnand %p1761_p3, %p1757_p0 }
  0x5c   : > { %1765 = shalt.err (!%p1762_p6)
}
  0x5d   : > { %s1766_s30 = scalar_lea.vmem %s322_s25, 128  ;;  %s1858_s17 = smov [#allocation2]  }
  0x5e   : > { %p1767_p9 = scmp.ne.s32.totalorder %s322_s25, %s1766_s30  ;;  %s1771_s18 = sshll.u32 %s1858_s17, 4  ;;  %s1772_s18 = int_to_ptr.vmem [resolvable:$false] %s1771_s18 }
  0x5f   : > { %s1773_s21 = scalar_lea.vmem %s1772_s18, 256  ;;  %p1774_p13 = scmp.lt.s32.totalorder %s322_s25, %s1772_s18 }
  0x60   : > { %p1769_p10 = pnand %p1767_p9, %p2386_p7  ;;  %p1775_p4 = scmp.lt.s32.totalorder %s1773_s21, %s1766_s30 }
  0x62   : > { %p1770_p11 = pneg %p1769_p10  ;;  %p1776_p5 = por %p1775_p4, %p1774_p13 }
  0x64   : > { %p1777_p8 = pnand %p1776_p5, %p1770_p11 }
  0x66   : > { %1780 = shalt.err (!%p1777_p8)
}
  0x67   : > { %1612 = dma.hbm_to_vmem [thread:$0]  (!%p1991_p12), %s2046_s23, 128, %s322_s25, %s311_s19  }
  0x68   : > { %s350_s1 = scalar_lea.vmem [#allocation6], %s1986_s29  ;;  %s1781_s3 = scalar_lea.hbm %s2053_s22, 128 }
  0x69   : > { %s357_s6 = sshll.u32 %s350_s1, 4  ;;  %p1782_p0 = scmp.ne.s32.totalorder %s2053_s22, %s1781_s3  ;;  %s358_s6 = int_to_ptr.vmem [resolvable:$true] %s357_s6 }
  0x6a   : > { %s1786_s20 = scalar_lea.hbm %s2351_s2, 256  ;;  %p1787_p3 = scmp.lt.s32.totalorder %s2053_s22, %s2351_s2 }
  0x6b   : > { %p1784_p2 = pnand %p1782_p0, %p2386_p7  ;;  %p1788_p6 = scmp.lt.s32.totalorder %s1786_s20, %s1781_s3 }
  0x6d   : > { %p1785_p1 = pneg %p1784_p2  ;;  %p1789_p9 = por %p1788_p6, %p1787_p3 }
  0x6f   : > { %p1790_p10 = pnand %p1789_p9, %p1785_p1 }
  0x71   : > { %1793 = shalt.err (!%p1790_p10)
}
  0x72   : > { %s1794_s29 = scalar_lea.vmem %s358_s6, 128  ;;  %s1859_s23 = smov [#allocation6]  }
  0x73   : > { %p1795_p11 = scmp.ne.s32.totalorder %s358_s6, %s1794_s29  ;;  %s1799_s25 = sshll.u32 %s1859_s23, 4  ;;  %s1800_s25 = int_to_ptr.vmem [resolvable:$false] %s1799_s25 }
  0x74   : > { %s1801_s19 = scalar_lea.vmem %s1800_s25, 256  ;;  %p1802_p5 = scmp.lt.s32.totalorder %s358_s6, %s1800_s25 }
  0x75   : > { %p1797_p13 = pnand %p1795_p11, %p2386_p7  ;;  %p1803_p8 = scmp.lt.s32.totalorder %s1801_s19, %s1794_s29 }
  0x77   : > { %p1798_p4 = pneg %p1797_p13  ;;  %p1804_p0 = por %p1803_p8, %p1802_p5 }
  0x79   : > { %p1805_p2 = pnand %p1804_p0, %p1798_p4 }
  0x7b   : > { %1808 = shalt.err (!%p1805_p2)
}
  0x7c   : > { %1618 = dma.hbm_to_vmem [thread:$0]  (!%p1991_p12), %s2053_s22, 128, %s358_s6, %s2005_s28  }
  0x7d   : > { %p2387_p1 = scmp.ne.s32.totalorder %s2374_s15, 0 }
  0x7e   : > { %s368_s12 = sand.u32 (!%p2387_p1), 1, %s1843_s10   ;;  %p2388_p7 = scmp.ne.s32.totalorder (!%p2387_p1), %s2373_s14, 0 }
  0x7f   : > { %366 = sbr.rel (%p2387_p1) target bundleno = 1189 (0x4a5), region = 56  ;;  %s2094_s17 = sshll.u32 (!%p2387_p1), %s368_s12, 3 }
  0x80   : > { %s369_s18 = scalar_lea.sflag (!%p2387_p1), [#allocation3], %s368_s12  ;;  %s372_s21 = scalar_lea.vmem (!%p2387_p1), [#allocation2], %s2094_s17 }
  0x84   : > { %1826 = dma.done.wait (%p2388_p7), %s369_s18, 128  }
  0x85   : > { %1828 = vsyncadd (%p2388_p7), %s369_s18, 4294967168  ;;  %s377_s28 = sand.u32 1, %s1936_s13   ;;  %s381_s15 = scalar_lea.vmem [#allocation4], %s2094_s17 }
  0x86   : > { %s378_s16 = scalar_lea.sflag [#allocation5], %s377_s28 }
  0x87   : > { %1830 = dma.done.wait (%p2388_p7), %s378_s16, 256  }
  0x88   : > { %1832 = vsyncadd (%p2388_p7), %s378_s16, 4294967040  ;;  %s390_s22 = scalar_lea.vmem [#allocation6], %s2094_s17  ;;  %p2389_p12 = scmp.eq.s32.totalorder %s1936_s13, 0 }
  0x8a   : > { %1834 = dma.done.wait (%p2389_p12), [#allocation8], 320   ;;  %p2390_p3 = pmov %p2389_p12 }
  0x8b   : > { %v451_v0 = vlaneseq  ;;  %v1860_v1 = vmov 0.0   ;;  %vm1861_vm0 = vmmov 0   ;;  %vm467_vm1 = vcmask 1043456   ;;  %v515_v6 = vld [vmem:[#allocation7] sm:$0xf]  ;;  %v2121_v7 = vld [vmem:[%s390_s22] sm:$0xff] }
  0x8c   : > { %1836 = vsyncadd (%p2390_p3), [#allocation8], 4294966976  ;;  %1526 = vmatprep.subr.bf16.mxu0 %v1860_v1  ;;  %1532 = vmatprep.subr.bf16.mxu1 %v1860_v1  ;;  %v520_v8 = vsel %vm467_vm1, %v515_v6, 0  ;;  %v2126_v9 = vpack.c.bf16 %v2121_v7, %v2121_v7  ;;  %v716_v10 = vld [vmem:[#allocation7 + $0x8] sm:$0xf]  ;;  %vm463_vm5 = vcmask 64512  }
  0x8d   : > { %v452_v2 = vand.u32 127, %v451_v0  ;;  %v2114_v3 = vshrl.u32 %v451_v0, 7  ;;  %1528 = vmatprep.mubr.msk.bf16.mxu0 %vm1861_vm0, %v1860_v1  ;;  %1534 = vmatprep.mubr.msk.bf16.mxu1 %vm1861_vm0, %v1860_v1  ;;  %v449_v12 = vld [vmem:[%s381_s15] sm:$0xff]  ;;  %v718_v13 = vsel %vm467_vm1, %v716_v10, 0  ;;  %v1070_v19 = vld [vmem:[%s2353_s4] sm:$0xf] }
  0x8e   : > { %1533 = vmatpush3.bf16.msra.mxu1 %v520_v8  ;;  %v621_v15 = vld [vmem:[#allocation7 + $0x4] sm:$0xf]  ;;  %v2134_v17 = vpack.c.bf16 %v449_v12, %v449_v12  ;;  %v1072_v20 = vsel %vm467_vm1, %v1070_v19, 0  ;;  %v811_v21 = vld [vmem:[#allocation7 + $0xc] sm:$0xf]  ;;  %vm1025_vm6 = vcmask 1040384  }
  0x8f   : > { %v455_v4 = vmul.u32 4, %v2114_v3  ;;  %1544 = vmatprep.subr.bf16.mxu1 %v1860_v1  ;;  %v623_v18 = vsel %vm467_vm1, %v621_v15, 0  ;;  %v813_v22 = vsel %vm467_vm1, %v811_v21, 0  ;;  %v1862_v23 = vmov 1966171168   ;;  %s1863_s20 = smov 112  }
  0x90   : > { %v565_v24 = vunpack.c.l.s4 %v1862_v23  ;;  %v2187_v58 = vsub.s32 0, %v2114_v3  ;;  %vm1034_vm7 = vcmask 1041408   ;;  %vm1043_vm8 = vcmask 1042432   ;;  %s1864_s29 = smov 16   ;;  %s1865_s23 = smov 120  }
  0x91   : > { %vm456_vm2 = vcmp.ge.s32.totalorder %v452_v2, %v455_v4  ;;  %v457_v5 = vadd.s32 4, %v455_v4  ;;  %1535 = vmatmul.mubr.msk.bf16.vlgmr.msra.gmra.mxu1 %vm463_vm5, %v2126_v9  ;;  %vm1158_vm9 = vcmask 261120   ;;  %s1866_s25 = smov 8   ;;  %p442_p6 = scmp.lt.s32.totalorder %s1936_s13, 1 }
  0x92   : > { %1545 = vmatpush3.bf16.msra.mxu1 %v718_v13  ;;  %1546 = vmatprep.mubr.msk.bf16.mxu1 %vm1861_vm0, %v1860_v1  ;;  %v566_v26 = vunpack.c.0.s8 %v565_v24 }
  0x93   : > { %vm458_vm3 = vcmp.lt.s32.totalorder %v452_v2, %v457_v5  ;;  %1556 = vmatprep.subr.bf16.mxu1 %v1860_v1  ;;  %s2397_s13 = smov (!%p442_p6, %s1936_s13), 1 }
  0x94   : > { %vm459_vm4 = vmand %vm456_vm2, %vm458_vm3  ;;  %v2172_v30 = vsub.s32 %v566_v26, %v2114_v3  ;;  %s1488_s19 = sshll.u32 %s2397_s13, 3 }
  0x95   : > { %v1489_v11 = vsel %vm459_vm4, 1.0, %v1860_v1  ;;  %s445_s18 = scalar_lea.vmem %s2358_s9, %s1488_s19 }
  0x96   : > { %v462_v14 = vpack.c.bf16 %v1489_v11, %v1489_v11 }
  0x98   : > { %v469_v16 = vsel %vm467_vm1, %v462_v14, 0 }
  0x99   : > { %1527 = vmatpush3.bf16.msra.mxu0 %v469_v16  ;;  %1547 = vmatmul.mubr.msk.bf16.vlgmr.msra.gmra.mxu1 %vm463_vm5, %v2126_v9 }
  0x9a   : > { %1538 = vmatprep.subr.bf16.mxu0 %v1860_v1  ;;  %1557 = vmatpush3.bf16.msra.mxu1 %v1072_v20 }
  0x9b   : > { %1558 = vmatprep.mubr.msk.bf16.mxu1 %vm1861_vm0, %v1860_v1  ;;  %1568 = vmatprep.subr.bf16.mxu1 %v1860_v1 }
  0x9c   : > { %1529 = vmatmul.mubr.msk.bf16.vlgmr.msra.gmra.mxu0 %vm463_vm5, %v2134_v17 }
  0x9d   : > { %1539 = vmatpush3.bf16.msra.mxu0 %v623_v18  ;;  %1540 = vmatprep.mubr.msk.bf16.mxu0 %vm1861_vm0, %v1860_v1 }
  0x9e   : > { %1550 = vmatprep.subr.bf16.mxu0 %v1860_v1 }
  0xa1   : > { %1559 = vmatmul.mubr.msk.bf16.vlgmr.msra.gmra.mxu1 %vm463_vm5, %v2126_v9 }
  0xa2   : > { %1572 = vmatprep.mubr.msk.bf16.mxu1 %vm1861_vm0, %v1860_v1 }
  0xa4   : > { %1541 = vmatmul.mubr.msk.bf16.vlgmr.msra.gmra.mxu0 %vm463_vm5, %v2126_v9 }
  0xa5   : > { %1551 = vmatpush3.bf16.msra.mxu0 %v813_v22  ;;  %1552 = vmatprep.mubr.msk.bf16.mxu0 %vm1861_vm0, %v1860_v1 }
  0xa6   : > { %1562 = vmatprep.subr.bf16.mxu0 %v1860_v1 }
  0xac   : > { %1553 = vmatmul.mubr.msk.bf16.vlgmr.msra.gmra.mxu0 %vm463_vm5, %v2126_v9 }
  0xad   : > { %1564 = vmatprep.mubr.msk.bf16.mxu0 %vm1861_vm0, %v1860_v1 }
 0x151   : > { %v556_v25 = vpop.f32.mrf.mxu1 }
 0x152   : > { %v563_v31 = vcombine.high %v556_v25, %v556_v25  ;;  %v570_v38 = vrot.slane %v556_v25, %v2172_v30 }
 0x153   : > { %v1536_v27 = vpop.f32.mrf.mxu1 }
 0x154   : > { %v577_v39 = vrot.slane %v563_v31, %v2172_v30  ;;  %v578_v46 = vcombine.high %v570_v38, %v570_v38  ;;  %v2190_v59 = vrot.slane %v570_v38, %v2172_v30 }
 0x155   : > { %v559_v28 = vpop.f32.mrf.mxu1 }
 0x156   : > { %v579_v47 = vcombine.high %v577_v39, %v577_v39  ;;  %v2193_v61 = vrot.slane %v577_v39, %v2172_v30  ;;  %v2196_v62 = vrot.slane %v578_v46, %v2172_v30  ;;  %v608_v15 = vcombine.high %v2190_v59, %v2190_v59 }
 0x157   : > { %v1537_v32 = vpop.f32.mrf.mxu1 }
 0x158   : > { %v2199_v63 = vrot.slane %v579_v47, %v2172_v30  ;;  %v609_v20 = vcombine.high %v2193_v61, %v2193_v61  ;;  %v610_v21 = vcombine.high %v2196_v62, %v2196_v62 }
 0x159   : > { %v754_v34 = vpop.f32.mrf.mxu1 }
 0x15a   : > { %v761_v36 = vcombine.high %v754_v34, %v754_v34  ;;  %v768_v37 = vrot.slane %v754_v34, %v2172_v30  ;;  %v611_v22 = vcombine.high %v2199_v63, %v2199_v63 }
 0x15b   : > { %v1548_v40 = vpop.f32.mrf.mxu1 }
 0x15c   : > { %v2169_v29 = vpop.f32.mrf.mxu0  ;;  %v775_v42 = vrot.slane %v761_v36, %v2172_v30  ;;  %v776_v43 = vcombine.high %v768_v37, %v768_v37  ;;  %v2180_v51 = vrot.slane %v768_v37, %v2172_v30 }
 0x15d   : > { %v757_v44 = vpop.f32.mrf.mxu1 }
 0x15e   : > { %v1530_v33 = vpop.f32.mrf.mxu0  ;;  %v777_v55 = vcombine.high %v775_v42, %v775_v42  ;;  %v2184_v56 = vrot.slane %v776_v43, %v2172_v30  ;;  %v2203_v3 = vrot.slane %v775_v42, %v2172_v30  ;;  %v806_v5 = vcombine.high %v2180_v51, %v2180_v51 }
 0x15f   : > { %v1549_v50 = vpop.f32.mrf.mxu1  ;;  %v948_v23 = vrot.slane %v2180_v51, %v2187_v58 }
 0x160   : > { %v508_v35 = vpop.f32.mrf.mxu0  ;;  %v2210_v12 = vrot.slane %v777_v55, %v2172_v30  ;;  %v808_v13 = vcombine.high %v2184_v56, %v2184_v56  ;;  %v807_v26 = vcombine.high %v2203_v3, %v2203_v3  ;;  %v952_v27 = vrot.slane %v2184_v56, %v2187_v58 }
 0x161   : > { %v1108_v57 = vpop.f32.mrf.mxu1  ;;  %v2231_v28 = vrot.slane %v806_v5, %v2187_v58  ;;  %v964_v37 = vrot.slane %v2203_v3, %v2187_v58 }
 0x162   : > { %v1531_v41 = vpop.f32.mrf.mxu0  ;;  %v1114_v8 = vpack.c.bf16 %v1108_v57, %v1108_v57  ;;  %v809_v34 = vcombine.high %v2210_v12, %v2210_v12  ;;  %v960_v35 = vrot.slane %v808_v13, %v2187_v58  ;;  %v968_v38 = vrot.slane %v2210_v12, %v2187_v58 }
 0x163   : > { %v1560_v2 = vpop.f32.mrf.mxu1  ;;  %v972_v47 = vrot.slane %v807_v26, %v2187_v58 }
 0x164   : > { %v659_v45 = vpop.f32.mrf.mxu0  ;;  %v1116_v19 = vsel %vm467_vm1, %v1114_v8, 0  ;;  %v976_v55 = vrot.slane %v809_v34, %v2187_v58 }
 0x165   : > { %v666_v48 = vcombine.high %v659_v45, %v659_v45  ;;  %v673_v49 = vrot.slane %v659_v45, %v2172_v30  ;;  %v1111_v14 = vpop.f32.mrf.mxu1  ;;  %1563 = vmatpush3.bf16.msra.mxu0 %v1116_v19 }
 0x166   : > { %v1542_v52 = vpop.f32.mrf.mxu0  ;;  %1576 = vmatprep.subr.bf16.mxu0 %v1860_v1 }
 0x167   : > { %v680_v53 = vrot.slane %v666_v48, %v2172_v30  ;;  %v681_v54 = vcombine.high %v673_v49, %v673_v49  ;;  %v689_v16 = vrot.slane %v673_v49, %v2172_v30  ;;  %v1561_v24 = vpop.f32.mrf.mxu1 }
 0x168   : > { %v662_v60 = vpop.f32.mrf.mxu0  ;;  %1565 = vmatmul.mubr.msk.bf16.vlgmr.msra.gmra.mxu0 %vm463_vm5, %v2134_v17 }
 0x169   : > { %v682_v0 = vcombine.high %v680_v53, %v680_v53  ;;  %v703_v4 = vrot.slane %v681_v54, %v2172_v30  ;;  %v696_v10 = vrot.slane %v680_v53, %v2172_v30  ;;  %v711_v36 = vcombine.high %v689_v16, %v689_v16  ;;  %1578 = vmatprep.mubr.msk.bf16.mxu0 %vm1861_vm0, %v1860_v1 }
 0x16a   : > { %v1543_v6 = vpop.f32.mrf.mxu0  ;;  %v908_v41 = vrot.slane %v689_v16, %v2187_v58 }
 0x16b   : > { %v710_v11 = vrot.slane %v682_v0, %v2172_v30  ;;  %v713_v25 = vcombine.high %v703_v4, %v703_v4  ;;  %v712_v32 = vcombine.high %v696_v10, %v696_v10  ;;  %v912_v42 = vrot.slane %v703_v4, %v2187_v58 }
 0x16c   : > { %v849_v18 = vpop.f32.mrf.mxu0  ;;  %v924_v43 = vrot.slane %v696_v10, %v2187_v58  ;;  %v916_v54 = vrot.slane %v711_v36, %v2187_v58  ;;  %v1026_v0 = vsel %vm1025_vm6, %v2190_v59, %v908_v41 }
 0x16d   : > { %v714_v33 = vcombine.high %v710_v11, %v710_v11  ;;  %v856_v39 = vcombine.high %v849_v18, %v849_v18  ;;  %v863_v44 = vrot.slane %v849_v18, %v2172_v30  ;;  %v920_v45 = vrot.slane %v713_v25, %v2187_v58 }
 0x16e   : > { %v1554_v31 = vpop.f32.mrf.mxu0  ;;  %v928_v46 = vrot.slane %v710_v11, %v2187_v58  ;;  %v932_v49 = vrot.slane %v712_v32, %v2187_v58  ;;  %v1027_v2 = vsel %vm1025_vm6, %v2196_v62, %v912_v42  ;;  %v1030_v4 = vsel %vm1025_vm6, %v2193_v61, %v924_v43  ;;  %v512_v42 = vld [vmem:[%s372_s21] sm:$0xff] }
 0x16f   : > { %v870_v17 = vrot.slane %v856_v39, %v2172_v30  ;;  %v936_v50 = vrot.slane %v714_v33, %v2187_v58  ;;  %v871_v52 = vcombine.high %v863_v44, %v863_v44  ;;  %v879_v53 = vrot.slane %v863_v44, %v2172_v30 }
 0x170   : > { %v852_v40 = vpop.f32.mrf.mxu0  ;;  %v1031_v5 = vsel %vm1025_vm6, %v2199_v63, %v928_v46  ;;  %v1029_v11 = vsel %vm1025_vm6, %v610_v21, %v920_v45  ;;  %v1032_v12 = vsel %vm1025_vm6, %v609_v20, %v932_v49  ;;  %v1039_v63 = vsel %vm1034_vm7, %v1030_v4, %v964_v37 }
 0x171   : > { %v872_v57 = vcombine.high %v870_v17, %v870_v17  ;;  %v886_v60 = vrot.slane %v870_v17, %v2172_v30  ;;  %v893_v3 = vrot.slane %v871_v52, %v2172_v30  ;;  %v901_v8 = vcombine.high %v879_v53, %v879_v53  ;;  %v1257_v17 = vld [vmem:[#allocation9] sm:$0xf] }
 0x172   : > { %v1555_v48 = vpop.f32.mrf.mxu0  ;;  %v1033_v14 = vsel %vm1025_vm6, %v611_v22, %v936_v50  ;;  %v1040_v20 = vsel %vm1034_vm7, %v1031_v5, %v968_v38  ;;  %v988_v26 = vrot.slane %v879_v53, %v2187_v58  ;;  %v1041_v59 = vsel %vm1034_vm7, %v1032_v12, %v972_v47 }
 0x173   : > { %v900_v6 = vrot.slane %v872_v57, %v2172_v30  ;;  %v902_v10 = vcombine.high %v886_v60, %v886_v60  ;;  %v903_v13 = vcombine.high %v893_v3, %v893_v3  ;;  %v1004_v16 = vrot.slane %v886_v60, %v2187_v58 }
 0x174   : > { %v1028_v30 = vsel %vm1025_vm6, %v608_v15, %v916_v54  ;;  %v992_v21 = vrot.slane %v893_v3, %v2187_v58  ;;  %v996_v22 = vrot.slane %v901_v8, %v2187_v58  ;;  %v1042_v15 = vsel %vm1034_vm7, %v1033_v14, %v976_v55 }
 0x175   : > { %v904_v62 = vcombine.high %v900_v6, %v900_v6  ;;  %v1008_v61 = vrot.slane %v900_v6, %v2187_v58  ;;  %v1012_v18 = vrot.slane %v902_v10, %v2187_v58  ;;  %v1000_v19 = vrot.slane %v903_v13, %v2187_v58  ;;  %v1498_v6 = vld [vmem:[%s2356_s7] ss:$0 sm:$0xff] }
 0x176   : > { %v1038_v31 = vsel %vm1034_vm7, %v1029_v11, %v960_v35  ;;  %v1048_v32 = vsel %vm1043_vm8, %v1039_v63, %v1004_v16  ;;  %v1036_v37 = vsel %vm1034_vm7, %v1027_v2, %v952_v27  ;;  %v1037_v38 = vsel %vm1034_vm7, %v1028_v30, %v2231_v28 }
 0x177   : > { %v1016_v24 = vrot.slane %v904_v62, %v2187_v58  ;;  %v1049_v25 = vsel %vm1043_vm8, %v1040_v20, %v1008_v61  ;;  %v1050_v33 = vsel %vm1043_vm8, %v1041_v59, %v1012_v18  ;;  %v1047_v36 = vsel %vm1043_vm8, %v1038_v31, %v1000_v19 }
 0x178   : > { %v1062_v39 = vcombine.low %v1048_v32, %v1049_v25  ;;  %v1045_v35 = vsel %vm1043_vm8, %v1036_v37, %v992_v21  ;;  %v1046_v41 = vsel %vm1043_vm8, %v1037_v38, %v996_v22  ;;  %v1035_v43 = vsel %vm1034_vm7, %v1026_v0, %v948_v23 }
 0x179   : > { %v1051_v34 = vsel %vm1043_vm8, %v1042_v15, %v1016_v24  ;;  %v1061_v56 = vcombine.low %v1046_v41, %v1047_v36  ;;  %v1044_v27 = vsel %vm1043_vm8, %v1035_v43, %v988_v26  ;;  %v511_v28 = vpack.c.bf16 %v2169_v29, %v2169_v29  ;;  %v1203_v29 = vld [vmem:[%s2354_s5] sm:$0xf] }
 0x17a   : > { %v1063_v40 = vcombine.low %v1050_v33, %v1051_v34  ;;  %v1060_v45 = vcombine.low %v1044_v27, %v1045_v35  ;;  %v513_v46 = vpack.c.bf16 %v512_v42, %v512_v42  ;;  %v1266_v51 = vsel %vm467_vm1, %v1257_v17, 0 }
 0x17b   : > { %v1215_v58 = vsel %vm467_vm1, %v1203_v29, 0 }
 0x17c   : > { %v1069_v44 = vpack.c.bf16 %v1063_v40, %v1062_v39  ;;  %v1068_v47 = vpack.c.bf16 %v1061_v56, %v1060_v45  ;;  %v514_v48 = vmul.bf16 %v513_v46, %v511_v28  ;;  %1577 = vmatpush3.bf16.msra.mxu0 %v1215_v58 }
 0x17e   : > { %1569 = vmatpush3.bf16.msra.mxu1 %v1069_v44 }
 0x17f   : > { %1570 = vmatprep.subr.bf16.mxu1 %v1860_v1 }
 0x182   : > { %1571 = vmatpush3.bf16.msra.mxu1 %v1068_v47 }
 0x183   : > { %1582 = vmatprep.subr.bf16.mxu1 %v1860_v1 }
 0x185   : > { %1573 = vmatmul.mubr.msk.bf16.vlgmr.msra.gmra.mxu1 %vm1158_vm9, %v514_v48 }
 0x186   : > { %1583 = vmatpush3.bf16.msra.mxu1 %v1266_v51  ;;  %1584 = vmatprep.mubr.msk.bf16.mxu1 %vm1861_vm0, %v1860_v1 }
 0x18d   : > { %1585 = vmatmul.mubr.msk.bf16.vlgmr.msra.gmra.mxu1 %vm463_vm5, %v2126_v9  ;;  %v1500_v9 = vld [vmem:[%s2357_s8] ss:$0 sm:$0xff] }
 0x228   : > { %v1152_v23 = vpop.f32.mrf.mxu0 }
 0x22a   : > { %v1566_v49 = vpop.f32.mrf.mxu0 }
 0x22c   : > { %v1155_v50 = vpop.f32.mrf.mxu0 }
 0x22e   : > { %v1567_v52 = vpop.f32.mrf.mxu0 }
 0x245   : > { %v1196_v53 = vpop.f32.mrf.mxu1 }
 0x246   : > { %v1197_v54 = vadd.f32 %v1196_v53, %v1152_v23 }
 0x247   : > { %v1574_v55 = vpop.f32.mrf.mxu1 }
 0x248   : > { %v1202_v57 = vpack.c.bf16 %v1197_v54, %v1197_v54 }
 0x249   : > { %v1199_v60 = vpop.f32.mrf.mxu1 }
 0x24a   : > { %1579 = vmatmul.mubr.msk.bf16.vlgmr.msra.gmra.mxu0 %vm463_vm5, %v1202_v57 }
 0x24b   : > { %v1575_v1 = vpop.f32.mrf.mxu1 }
 0x24d   : > { %v1302_v0 = vpop.f32.mrf.mxu1 }
 0x24e   : > { %v1303_v2 = vadd.f32 %v1500_v9, %v1302_v0 }
 0x24f   : > { %v1586_v4 = vpop.f32.mrf.mxu1 }
 0x250   : > { %1316 = vrot.lane.b32.xlu0 %v1303_v2, %s1863_s20 }
 0x251   : > { %v1305_v3 = vpop.f32.mrf.mxu1 }
 0x253   : > { %v1587_v5 = vpop.f32.mrf.mxu1 }
 0x2c2   : > { %v1317_v18 = vpop.permute.xlu0 %1316 }
 0x30a   : > { %v1251_v8 = vpop.f32.mrf.mxu0 }
 0x30b   : > { %v1252_v10 = vadd.f32 %v1498_v6, %v1251_v8 }
 0x30c   : > { %v1580_v11 = vpop.f32.mrf.mxu0 }
 0x30d   : > { %v1308_v12 = vadd.f32 %v1303_v2, %v1252_v10 }
 0x30e   : > { %v1254_v13 = vpop.f32.mrf.mxu0 }
 0x30f   : > { %v1502_v14 = vmul.f32 -1.442695, %v1308_v12 }
 0x310   : > { %v1581_v62 = vpop.f32.mrf.mxu0 }
 0x311   : > { %1667 = vpow2.f32 %v1502_v14 }
 0x31e   : > { %v1668_v16 = vpop.eup %1667 }
 0x31f   : > { %v1312_v61 = vadd.f32 1.0, %v1668_v16 }
 0x321   : > { %1669 = vrcp.f32 %v1312_v61 }
 0x32e   : > { %v1670_v30 = vpop.eup %1669 }
 0x32f   : > { %v1319_v63 = vmul.f32 %v1670_v30, %v1317_v18  ;;  %v1326_v24 = vsub.f32 1.0, %v1670_v30 }
 0x331   : > { %1321 = vrot.lane.b32.xlu0 %v1319_v63, %s1864_s29 }
 0x3a3   : > { %v1322_v19 = vpop.permute.xlu0 %1321 }
 0x3a4   : > { %v1324_v20 = vadd.f32 %v1322_v19, %v1252_v10 }
 0x3a6   : > { %1671 = vtanh.f32 %v1324_v20 }
 0x3b3   : > { %v1672_v21 = vpop.eup %1671 }
 0x3b4   : > { %1328 = vrot.lane.b32.xlu1 %v1672_v21, %s1865_s23 }
 0x3b8   : > { %1333 = vrot.lane.b32.xlu1 %v2121_v7, %s1866_s25 }
 0x426   : > { %v1329_v22 = vpop.permute.xlu1 %1328 }
 0x427   : > { %v1331_v26 = vmul.f32 %v1329_v22, %v1326_v24 }
 0x42a   : > { %v1334_v25 = vpop.permute.xlu1 %1333 }
 0x42b   : > { %v1336_v59 = vmul.f32 %v1670_v30, %v1334_v25 }
 0x42d   : > { %v1337_v15 = vadd.f32 %v1336_v59, %v1331_v26 }
 0x42f   : > { %v1338_v31 = vadd.f32 %v1337_v15, %v1334_v25 }
 0x431   : > { %1340 = vrot.lane.b32.xlu0 %v1338_v31, %s1865_s23 }
 0x4a3   : > { %v1341_v32 = vpop.permute.xlu0 %1340 }
 0x4a4   : > { %1343 = vst.msk [vmem:[%s445_s18] sm:$0xff] %vm463_vm5, %v1341_v32 }
 0x4a5 PF: > { %s2391_s12 = sld [smem:[#allocation13_spill]]  ;;  %s2393_s30 = smov %s1843_s10 }
 0x4a6   : > { %s2392_s21 = sld [smem:[#allocation14_spill]]  ;;  %s2394_s10 = smov %s1847_s11 }
 0x4ab   : > { %p23_p9 = scmp.ge.s32.totalorder %s2391_s12, 4  }
 0x4ac   : > { %s2395_s11 = smov %s2392_s21 }
 0x4ad   :  { %25 = sbr.rel (!%p23_p9) target bundleno = 10 (0xa), region = 131 }
 0x4b2   :  { %1363 = vsyncpa [#allocation3], 1 }
 0x4b3   :  { %1365 = vsyncpa [#allocation3 + $0x1], 1 }
 0x4b4   :  { %1366 = vsyncpa [#allocation5], 1 }
 0x4b5   :  { %1368 = vsyncpa [#allocation5 + $0x1], 1 }
 0x4b6   :  { %1369 = vsyncpa [#allocation8], 1 }

</bundles_post_ra>
